<compile_context>
chip_gen: v5e
topology: v5e:2x2
jax: 0.10.0
libtpu: 0.0.40
codegen_flags: <defaults>
</compile_context>

<pallas_src>
import jax
import jax.numpy as jnp
from jax.experimental import pallas as pl
from jax.experimental.pallas import tpu as pltpu

LANES = 128           # vreg lane width (fast axis)
SUBLANES = 8          # f32 sublane count
MAX_BLOCK_ROWS = 512  # 512x128 f32 tile = 256 KiB; in+out double-buffered ~1 MiB
                      # -> comfortably inside v7x's 64 MiB VMEM (and v5e/v6e).


def linear_kernel(w_ref, b_ref, x_ref, o_ref):
    # Linear(1, 1) collapses to an elementwise fused multiply-add on the VPU.
    # Keep it off the MXU: the kernel is HBM-streaming bound, not FLOP bound.
    w = w_ref[0]
    b = b_ref[0]
    o_ref[...] = (x_ref[...] * w + b).astype(o_ref.dtype)


def _round_up(v, m):
    return ((v + m - 1) // m) * m


def linear_forward(x, weight, bias):
    """x: [N, 1], weight: [1, 1], bias: [1] -> [N, 1] (== nn.Linear(1,1))."""
    n, f = x.shape
    assert f == 1 and weight.shape == (1, 1) and bias.shape == (1,)
    dtype = x.dtype

    w_scalar = weight.reshape((1,)).astype(jnp.float32)
    b_scalar = bias.reshape((1,)).astype(jnp.float32)

    # Lane-dense layout: view the N scalars as a [rows, 128] slab.
    rows_needed = pl.cdiv(n, LANES)
    block_rows = min(MAX_BLOCK_ROWS, _round_up(rows_needed, SUBLANES))
    num_blocks = pl.cdiv(rows_needed, block_rows)
    padded_rows = num_blocks * block_rows
    padded_n = padded_rows * LANES

    x_flat = x.reshape((n,))
    if padded_n != n:
        x_flat = jnp.pad(x_flat, (0, padded_n - n))  # pad rows computed then discarded
    x2d = x_flat.reshape((padded_rows, LANES))

    y2d = pl.pallas_call(
        linear_kernel,
        out_shape=jax.ShapeDtypeStruct((padded_rows, LANES), dtype),
        grid=(num_blocks,),
        in_specs=[
            pl.BlockSpec(memory_space=pltpu.SMEM),                # weight scalar
            pl.BlockSpec(memory_space=pltpu.SMEM),                # bias scalar
            pl.BlockSpec((block_rows, LANES), lambda i: (i, 0)),  # x tile (lane-dense)
        ],
        out_specs=pl.BlockSpec((block_rows, LANES), lambda i: (i, 0)),
        compiler_params=pltpu.CompilerParams(
            dimension_semantics=("parallel",),
        ),
    )(w_scalar, b_scalar, x2d)

    return y2d.reshape((padded_n,))[:n].reshape((n, 1))


if __name__ == "__main__":
    key = jax.random.PRNGKey(0)
    kx, kw, kb, kx2 = jax.random.split(key, 4)

    # Small shapes consistent with Linear(1, 1): batch=8, in_features=1
    x = jax.random.normal(kx, (8, 1), dtype=jnp.float32)

    # Deterministic parameter init (mimics nn.Linear uniform bound for fan_in=1)
    weight = jax.random.uniform(kw, (1, 1), minval=-1.0, maxval=1.0, dtype=jnp.float32)
    bias = jax.random.uniform(kb, (1,), minval=-1.0, maxval=1.0, dtype=jnp.float32)

    y = linear_forward(x, weight, bias)
    jax.block_until_ready(y)

    # Reference check in plain JAX
    y_ref = x @ weight.T + bias
    assert y.shape == y_ref.shape
    assert jnp.allclose(y, y_ref, atol=1e-6), "mismatch vs reference (small batch)"

    # Second check: non-multiple batch exercises padding + lane-dense path
    x_big = jax.random.normal(kx2, (1000, 1), dtype=jnp.float32)
    y_big = linear_forward(x_big, weight, bias)
    jax.block_until_ready(y_big)
    y_big_ref = x_big @ weight.T + bias
    assert y_big.shape == y_big_ref.shape
    assert jnp.allclose(y_big, y_big_ref, atol=1e-6), "mismatch vs reference (padded batch)"

    print("KERNEL_OK")
</pallas_src>

<mosaic_0001>
module attributes {stable_mosaic.version = 11 : i64} {
  func.func @linear_kernel(%arg0: i32, %arg1: memref<1xf32, #tpu.memory_space<smem>>, %arg2: memref<1xf32, #tpu.memory_space<smem>>, %arg3: memref<8x128xf32, #tpu.memory_space<vmem>>, %arg4: memref<8x128xf32, #tpu.memory_space<vmem>>) attributes {dimension_semantics = [#tpu.dimension_semantics<parallel>], iteration_bounds = array<i64: 1>, scalar_prefetch = 0 : i64, scratch_operands = 0 : i64, tpu.core_type = #tpu.core_type<tc>, window_params = [{transform_indices = @transform_0, window_bounds = array<i64: 1>}, {transform_indices = @transform_1, window_bounds = array<i64: 1>}, {transform_indices = @transform_2, window_bounds = array<i64: 8, 128>}, {transform_indices = @transform_3, window_bounds = array<i64: 8, 128>}]} {
    %c0 = arith.constant 0 : index
    %0 = memref.load %arg1[%c0] : memref<1xf32, #tpu.memory_space<smem>>
    %c0_0 = arith.constant 0 : index
    %1 = memref.load %arg2[%c0_0] : memref<1xf32, #tpu.memory_space<smem>>
    %c0_1 = arith.constant 0 : index
    %c0_2 = arith.constant 0 : index
    %2 = vector.load %arg3[%c0_1, %c0_2] : memref<8x128xf32, #tpu.memory_space<vmem>>, vector<8x128xf32>
    %3 = vector.broadcast %0 : f32 to vector<8x128xf32>
    %4 = arith.mulf %2, %3 : vector<8x128xf32>
    %5 = vector.broadcast %1 : f32 to vector<8x128xf32>
    %6 = arith.addf %4, %5 : vector<8x128xf32>
    %c0_3 = arith.constant 0 : index
    %c0_4 = arith.constant 0 : index
    %7 = vector.load %arg4[%c0_3, %c0_4] : memref<8x128xf32, #tpu.memory_space<vmem>>, vector<8x128xf32>
    tpu.vector_store %arg4[%c0_3, %c0_4], %6 {strides = array<i32>} : memref<8x128xf32, #tpu.memory_space<vmem>>, vector<8x128xf32>,
    return
  }
  func.func @transform_0(%arg0: i32) -> i32 {
    %c0_i32 = arith.constant 0 : i32
    %c0_i32_0 = arith.constant 0 : i32
    return %c0_i32 : i32
  }
  func.func @transform_1(%arg0: i32) -> i32 {
    %c0_i32 = arith.constant 0 : i32
    %c0_i32_0 = arith.constant 0 : i32
    return %c0_i32 : i32
  }
  func.func @transform_2(%arg0: i32) -> (i32, i32) {
    %c0_i32 = arith.constant 0 : i32
    %c0_i32_0 = arith.constant 0 : i32
    return %arg0, %c0_i32 : i32, i32
  }
  func.func @transform_3(%arg0: i32) -> (i32, i32) {
    %c0_i32 = arith.constant 0 : i32
    %c0_i32_0 = arith.constant 0 : i32
    return %arg0, %c0_i32 : i32, i32
  }
}

</mosaic_0001>

<bundles_post_ra>
// kernel: tpu_custom_call.1
= control target key start
LH: loop header
LB: loop body
LE: loop exit
PB: predicated region body
PF: predicated region fallthrough
CT: control target
= control target key end

     0   :  { %10 = vsyncpa [#allocation5], 0  ;;  %s144_s0 = inlined_call_operand.<no memory space> [shape: f32[1], index: 0, kind: input, shape index: {}]   ;;  %s145_s1 = inlined_call_operand.<no memory space> [shape: f32[1], index: 1, kind: input, shape index: {}]   ;;  %s146_s2 = inlined_call_operand.hbm [shape: f32[8,128], index: 2, kind: input, shape index: {}]   ;;  %s147_s3 = inlined_call_operand.hbm [shape: f32[8,128], index: 3, kind: output, shape index: {}]  }
   0x1   :  { %11 = vsyncpa [#allocation6], 0  ;;  %s21_s14 = sshll.u32 %s146_s2, 4  ;;  %s110_s15 = smov [#allocation4]   ;;  %s22_s14 = int_to_ptr.hbm [resolvable:$true] %s21_s14 }
   0x2   :  { %s23_s16 = sshll.u32 %s110_s15, 4  ;;  %s24_s16 = int_to_ptr.vmem [resolvable:$true] %s23_s16 }
   0x3   :  { %26 = dma.hbm_to_vmem [thread:$0]  %s22_s14, 128, %s24_s16, [#allocation5]  }
   0x4   :  { %106 = dma.done.wait [#allocation5], 128  }
   0x5   :  { %107 = vsyncadd [#allocation5], 4294967168  ;;  %v34_v0 = vstv %s144_s0  ;;  %v33_v1 = vld [vmem:[#allocation4] sm:$0xff]  ;;  %v36_v2 = vstv %s145_s1  ;;  %s111_s21 = smov [#allocation7]   ;;  %s46_s24 = sshll.u32 %s147_s3, 4  ;;  %s47_s24 = int_to_ptr.hbm [resolvable:$true] %s46_s24 }
   0x6   :  { %s44_s22 = sshll.u32 %s111_s21, 4  ;;  %v35_v3 = vmul.f32 %v34_v0, %v33_v1  ;;  %s45_s22 = int_to_ptr.vmem [resolvable:$true] %s44_s22 }
   0x8   :  { %v37_v4 = vadd.f32 %v36_v2, %v35_v3 }
   0xa   :  { %38 = vst [vmem:[#allocation7] sm:$0xff] %v37_v4 }
   0xb   :  { %49 = dma.vmem_to_hbm [thread:$0]  %s45_s22, 128, %s47_s24, [#allocation6]  }
   0xc   :  { %108 = dma.done.wait [#allocation6], 128  }
   0xd   :  { %109 = vsyncadd [#allocation6], 4294967168 }
   0xe   :  { %54 = vsyncpa [#allocation5], 1 }
   0xf   :  { %55 = vsyncpa [#allocation6], 1 }

</bundles_post_ra>
